<compile_context>
chip_gen: v5e
topology: v5e:2x2
jax: 0.10.0
libtpu: 0.0.40
codegen_flags: <defaults>
</compile_context>

<pallas_src>
import functools

import jax
import jax.numpy as jnp
from jax import lax
from jax.experimental import pallas as pl
from jax.experimental.pallas import tpu as pltpu


def _round_up(x, m):
    return (x + m - 1) // m * m


# ---------------------------------------------------------------------------
# Phase 1: online softmax stats for pi + gathering matmul, tiled over K*H*W.
# Outputs per batch group: running row-max m, 1/l, and tmpG^T (normalized).
# ---------------------------------------------------------------------------
def _stats_kernel(x_ref, w_ref, b_ref, m_ref, il_ref, gt_ref, *,
                  a_pad, n, tn, need_mask):
    kk = pl.program_id(1)
    t = pl.program_id(2)
    first = jnp.logical_and(kk == 0, t == 0)
    last = jnp.logical_and(kk == pl.num_programs(1) - 1,
                           t == pl.num_programs(2) - 1)

    @pl.when(first)
    def _():
        m_ref[0] = jnp.full((a_pad, 1), -jnp.inf, jnp.float32)
        il_ref[0] = jnp.zeros((a_pad, 1), jnp.float32)
        gt_ref[0] = jnp.zeros((a_pad, a_pad), jnp.float32)

    x16 = x_ref[0].astype(jnp.bfloat16)                         # (C, TN)
    # theta | pi 1x1 convs in ONE MXU matmul (f32 accumulation); conv biases
    # added with a (2A,1) -> (2A,TN) broadcast-add (VPU filler under the MXU).
    tp = jnp.dot(w_ref[...], x16,
                 preferred_element_type=jnp.float32) + b_ref[...]
    theta = tp[:a_pad]
    pi = tp[a_pad:]
    if need_mask:                                               # trace-time flag
        col = t * tn + lax.broadcasted_iota(jnp.int32, pi.shape, 1)
        pi = jnp.where(col < n, pi, -1e30)

    # flash-style online softmax over the K*H*W (lane) axis.
    m_prev = m_ref[0]
    m_new = jnp.maximum(m_prev, jnp.max(pi, axis=1, keepdims=True))
    alpha = jnp.exp(m_prev - m_new)                             # (a_pad, 1)
    p = jnp.exp(pi - m_new)                                     # (a_pad, TN)
    il_ref[0] = alpha * il_ref[0] + jnp.sum(p, axis=1, keepdims=True)
    # accumulate tmpG^T = p @ theta^T so every rescale is a sublane->lane
    # broadcast (no in-kernel transposes).
    gt_ref[0] = gt_ref[0] * alpha + lax.dot_general(
        p.astype(jnp.bfloat16), theta.astype(jnp.bfloat16),
        (((1,), (1,)), ((), ())), preferred_element_type=jnp.float32)
    m_ref[0] = m_new

    @pl.when(last)
    def _():
        inv_l = 1.0 / il_ref[0]          # exact: soft_pi is user visible
        il_ref[0] = inv_l
        gt_ref[0] = gt_ref[0] * inv_l    # tmpG^T = softmax_pi @ theta^T


# ---------------------------------------------------------------------------
# Phase 2: per-tile soft_pi / soft_g, distribution matmul, out conv (+residual).
# ---------------------------------------------------------------------------
def _out_kernel(x_ref, w_ref, b_ref, wz_ref, m_ref, il_ref, out_ref,
                *alpha_refs, a_pad, n, tn, need_mask, add_residual):
    x = x_ref[0]                                                # (C, TN) f32
    pg = jnp.dot(w_ref[...], x.astype(jnp.bfloat16),
                 preferred_element_type=jnp.float32) + b_ref[...]
    pi = pg[:a_pad]
    g = pg[a_pad:]
    if need_mask:
        t = pl.program_id(2)
        col = t * tn + lax.broadcasted_iota(jnp.int32, pi.shape, 1)
        pi = jnp.where(col < n, pi, -1e30)

    # softmax over K*H*W using the phase-1 statistics (exact normalization).
    soft_pi = jnp.exp(pi - m_ref[0]) * il_ref[0]

    # softmax over the attention-channel (sublane) axis; padded g rows carry a
    # -1e30 bias so exp() == 0 and the denominator only spans real rows.
    g = jnp.exp(g - jnp.max(g, axis=0, keepdims=True))
    soft_g = g / jnp.sum(g, axis=0, keepdims=True)              # exact reciprocal
    sg16 = soft_g.astype(jnp.bfloat16)

    # Reassociated tail: out = (w_out @ tmpG + b_out) @ soft_g.
    out = jnp.dot(wz_ref[0], sg16, preferred_element_type=jnp.float32)
    if add_residual:                                            # k == 1 path
        out = out + x
    out_ref[0] = out

    if alpha_refs:                                              # k > 1 path
        alpha_refs[0][0] = soft_pi.astype(jnp.bfloat16)
        alpha_refs[1][0] = sg16


def init_params(key, in_channels, attention_dim):
    """Deterministic conv-style init (uniform +/- 1/sqrt(fan_in))."""
    A, C = attention_dim, in_channels
    ks = jax.random.split(key, 8)

    def u(k, shape, fan_in):
        bound = 1.0 / (fan_in ** 0.5)
        return jax.random.uniform(k, shape, jnp.float32, -bound, bound)

    return dict(
        w_theta=u(ks[0], (A, C), C), b_theta=u(ks[1], (A,), C),
        w_pi=u(ks[2], (A, C), C), b_pi=u(ks[3], (A,), C),
        w_g=u(ks[4], (A, C), C), b_g=u(ks[5], (A,), C),
        w_out=u(ks[6], (C, A), A), b_out=u(ks[7], (C,), A),
    )


def asquare_forward(params, content, style=None, k=2):
    if k > 1:
        x = jnp.concatenate([content, style], axis=0)
    else:
        x = content
    b, C, h, w = x.shape
    A = params["w_theta"].shape[0]
    assert C == params["w_theta"].shape[1], "input channel not equal!"
    assert b % k == 0
    batch = b // k
    if k > 1:
        # torch.split(output, 1, dim=0) unpacks into exactly (content, style).
        assert batch == 1, "K>1 path assumes a single content/style pair"
    N = h * w
    KN = k * N

    a_pad = _round_up(A, 16)           # bf16 packed-sublane tile
    n_pad = _round_up(N, 128)          # lane-dense tiles / stores
    TN = 128
    for cand in (512, 384, 256, 128):  # largest spatial tile <= 512 lanes
        if n_pad % cand == 0:
            TN = cand
            break
    Tn = n_pad // TN
    need_mask = n_pad != N

    # Activations stay in native (b, C, H*W) f32 layout (reshape is free); the
    # kernels address sample p*k + kk directly -> no wrapper transpose pass.
    x_p = x.reshape(b, C, N)
    if need_mask:
        x_p = jnp.pad(x_p, ((0, 0), (0, 0), (0, n_pad - N)))

    def pad_rows(wname):
        return jnp.zeros((a_pad, C), jnp.float32).at[:A].set(params[wname])

    # Phase-1 weights: theta | pi stacked; biases as a (2A,1) column.
    wtp = jnp.concatenate([pad_rows("w_theta"), pad_rows("w_pi")],
                          axis=0).astype(jnp.bfloat16)
    btp = (jnp.zeros((2 * a_pad, 1), jnp.float32)
           .at[:A, 0].set(params["b_theta"])
           .at[a_pad:a_pad + A, 0].set(params["b_pi"]))
    # Phase-2 weights: pi | g stacked; padded g rows get a -1e30 bias so they
    # vanish from the channel softmax.
    wpg = jnp.concatenate([pad_rows("w_pi"), pad_rows("w_g")],
                          axis=0).astype(jnp.bfloat16)
    bpg = (jnp.zeros((2 * a_pad, 1), jnp.float32)
           .at[:A, 0].set(params["b_pi"])
           .at[a_pad:a_pad + A, 0].set(params["b_g"])
           .at[a_pad + A:, 0].set(-1e30))

    cost1 = pl.CostEstimate(
        flops=int(batch * KN * (4 * a_pad * C + 2 * a_pad * a_pad)),
        transcendentals=int(batch * KN * (a_pad + 1)),
        bytes_accessed=int(x_p.size * 4 + wtp.size * 2 + btp.size * 4
                           + batch * (a_pad * a_pad + 2 * a_pad) * 4))

    # ---- phase 1: pi-softmax stats + tmpG^T (reduction over k, KN tiles). ----
    m_i, inv_l, tmpGT = pl.pallas_call(
        functools.partial(_stats_kernel, a_pad=a_pad, n=N, tn=TN,
                          need_mask=need_mask),
        out_shape=(
            jax.ShapeDtypeStruct((batch, a_pad, 1), jnp.float32),
            jax.ShapeDtypeStruct((batch, a_pad, 1), jnp.float32),
            jax.ShapeDtypeStruct((batch, a_pad, a_pad), jnp.float32),
        ),
        grid_spec=pltpu.PrefetchScalarGridSpec(
            num_scalar_prefetch=0,
            grid=(batch, k, Tn),
            in_specs=[
                pl.BlockSpec((1, C, TN), lambda p, kk, t: (p * k + kk, 0, t)),
                pl.BlockSpec(wtp.shape, lambda p, kk, t: (0, 0)),
                pl.BlockSpec(btp.shape, lambda p, kk, t: (0, 0)),
            ],
            out_specs=[
                pl.BlockSpec((1, a_pad, 1), lambda p, kk, t: (p, 0, 0)),
                pl.BlockSpec((1, a_pad, 1), lambda p, kk, t: (p, 0, 0)),
                pl.BlockSpec((1, a_pad, a_pad), lambda p, kk, t: (p, 0, 0)),
            ],
        ),
        compiler_params=pltpu.CompilerParams(
            dimension_semantics=("parallel", "arbitrary", "arbitrary"),
            vmem_limit_bytes=32 * 1024 * 1024,   # per-step footprint << 32 MiB
        ),
        cost_estimate=cost1,
    )(x_p, wtp, btp)

    # Reassociated tail (tiny): wz = w_out @ tmpG + b_out.  Folding b_out into
    # every column is valid because soft_g columns sum to 1 over real rows.
    wz = (jnp.einsum("ci,bai->bca", params["w_out"], tmpGT[:, :, :A])
          + params["b_out"][None, :, None]).astype(jnp.bfloat16)

    return_alphas = k > 1
    out_shapes = [jax.ShapeDtypeStruct((b, C, n_pad), jnp.float32)]
    out_specs = [pl.BlockSpec((1, C, TN), lambda p, kk, t: (p * k + kk, 0, t))]
    if return_alphas:
        for _ in range(2):   # soft_pi, soft_g written back in bfloat16
            out_shapes.append(
                jax.ShapeDtypeStruct((batch, a_pad, k * n_pad), jnp.bfloat16))
            out_specs.append(
                pl.BlockSpec((1, a_pad, TN),
                             lambda p, kk, t: (p, 0, kk * Tn + t)))

    alpha_bytes = 2 * batch * a_pad * k * n_pad * 2 if return_alphas else 0
    cost2 = pl.CostEstimate(
        flops=int(batch * KN * (4 * a_pad * C + 2 * C * a_pad)),
        transcendentals=int(batch * KN * 2 * a_pad),
        bytes_accessed=int(x_p.size * 4 + wpg.size * 2 + wz.size * 2
                           + b * C * n_pad * 4 + alpha_bytes))

    # ---- phase 2: soft_pi / soft_g + distribution + out conv (all parallel). --
    results = pl.pallas_call(
        functools.partial(_out_kernel, a_pad=a_pad, n=N, tn=TN,
                          need_mask=need_mask, add_residual=(k == 1)),
        out_shape=tuple(out_shapes),
        grid_spec=pltpu.PrefetchScalarGridSpec(
            num_scalar_prefetch=0,
            grid=(batch, k, Tn),
            in_specs=[
                pl.BlockSpec((1, C, TN), lambda p, kk, t: (p * k + kk, 0, t)),
                pl.BlockSpec(wpg.shape, lambda p, kk, t: (0, 0)),
                pl.BlockSpec(bpg.shape, lambda p, kk, t: (0, 0)),
                pl.BlockSpec((1, C, a_pad), lambda p, kk, t: (p, 0, 0)),
                pl.BlockSpec((1, a_pad, 1), lambda p, kk, t: (p, 0, 0)),
                pl.BlockSpec((1, a_pad, 1), lambda p, kk, t: (p, 0, 0)),
            ],
            out_specs=out_specs,
        ),
        compiler_params=pltpu.CompilerParams(
            dimension_semantics=("parallel", "parallel", "parallel"),
            vmem_limit_bytes=32 * 1024 * 1024,
        ),
        cost_estimate=cost2,
    )(x_p, wpg, bpg, wz, m_i, inv_l)

    out_full = results[0]
    if need_mask:
        out_full = out_full[:, :, :N]
    output = out_full.reshape(b, C, h, w)

    if k > 1:
        spi = results[1].reshape(batch, a_pad, k, n_pad)[:, :A, :, :N]
        sg = results[2].reshape(batch, a_pad, k, n_pad)[:, :A, :, :N]
        # Mirror the torch raw .view() reinterpretations exactly; the layout
        # shuffles run on the bf16 data, f32 cast only for the returned arrays.
        alpha_gathering = (spi.reshape(batch, A, KN).transpose(0, 2, 1)
                           .reshape(batch, k, A, h, w).astype(jnp.float32))
        alpha_distribute = (sg.reshape(batch, A, KN)
                            .reshape(batch, k, A, h, w).astype(jnp.float32))
        content_update = output[0:1]
        style_update = output[1:2]
        return content_update, style_update, alpha_gathering, alpha_distribute
    return output          # k==1 residual (output + content) fused in-kernel


def asquare_reference(params, content, style=None, k=2):
    """Pure-JAX f32 mirror of the PyTorch forward (for sanity checking)."""
    if k > 1:
        x = jnp.concatenate([content, style], axis=0)
    else:
        x = content
    b, C, h, w = x.shape
    A = params["w_theta"].shape[0]
    batch = b // k
    N = h * w

    def conv1x1(x4, wname, bname):
        return (jnp.einsum("oc,bchw->bohw", params[wname], x4)
                + params[bname].reshape(1, -1, 1, 1))

    feat_theta = conv1x1(x, "w_theta", "b_theta")
    feat_pi = conv1x1(x, "w_pi", "b_pi")
    feat_g = conv1x1(x, "w_g", "b_g")

    tmp_theta = feat_theta.reshape(batch, k, A, N).transpose(0, 2, 1, 3).reshape(batch, A, k * N)
    tmp_pi = feat_pi.reshape(batch, k, A, N).transpose(0, 2, 1, 3).reshape(batch * A, k * N)
    tmp_g = feat_g.reshape(batch, k, A, N).transpose(0, 1, 3, 2).reshape(b * N, A)

    softmax_pi = jax.nn.softmax(tmp_pi, axis=1).reshape(batch, A, k * N).transpose(0, 2, 1)
    softmax_g = jax.nn.softmax(tmp_g, axis=1).reshape(batch, k * N, A).transpose(0, 2, 1)

    tmpG = jnp.matmul(tmp_theta, softmax_pi)
    tmpZ = jnp.matmul(tmpG, softmax_g)
    tmpZ = tmpZ.reshape(batch, A, k, N).transpose(0, 2, 1, 3).reshape(b, A, h, w)
    output = conv1x1(tmpZ, "w_out", "b_out")

    if k > 1:
        content_update = output[0:1]
        style_update = output[1:2]
        alpha_gathering = softmax_pi.reshape(batch, k, A, h, w)
        alpha_distribute = softmax_g.reshape(batch, k, A, h, w)
        return content_update, style_update, alpha_gathering, alpha_distribute
    return output + content


if __name__ == "__main__":
    key = jax.random.PRNGKey(0)
    in_channels, attention_dim, K = 4, 8, 2
    H = W = 16

    k_c, k_s, k_p = jax.random.split(key, 3)
    # K=2 path: torch.split(output, 1, dim=0) -> exactly one content/style pair.
    content = jax.random.normal(k_c, (1, in_channels, H, W), jnp.float32)
    style = jax.random.normal(k_s, (1, in_channels, H, W), jnp.float32)
    params = init_params(k_p, in_channels, attention_dim)

    outs = jax.block_until_ready(asquare_forward(params, content, style, k=K))
    refs = asquare_reference(params, content, style, k=K)
    # bf16 MXU operands / bf16 alpha writeback vs f32 reference -> loose tol.
    for got, ref in zip(outs, refs):
        assert got.shape == ref.shape, (got.shape, ref.shape)
        assert jnp.allclose(got, ref, rtol=5e-2, atol=5e-2), float(
            jnp.max(jnp.abs(got - ref)))

    # k == 1 path: no alphas, residual fused into the phase-2 store.
    out1 = jax.block_until_ready(asquare_forward(params, content, None, k=1))
    ref1 = asquare_reference(params, content, None, k=1)
    assert out1.shape == ref1.shape, (out1.shape, ref1.shape)
    assert jnp.allclose(out1, ref1, rtol=5e-2, atol=5e-2), float(
        jnp.max(jnp.abs(out1 - ref1)))

    print("KERNEL_OK")
</pallas_src>

<mosaic_0001>
module attributes {stable_mosaic.version = 11 : i64} {
  func.func @_stats_kernel(%arg0: i32, %arg1: i32, %arg2: i32, %arg3: memref<1x4x256xf32, #tpu.memory_space<vmem>>, %arg4: memref<32x4xbf16, #tpu.memory_space<vmem>>, %arg5: memref<32x1xf32, #tpu.memory_space<vmem>>, %arg6: memref<1x16x1xf32, #tpu.memory_space<vmem>>, %arg7: memref<1x16x1xf32, #tpu.memory_space<vmem>>, %arg8: memref<1x16x16xf32, #tpu.memory_space<vmem>>) attributes {dimension_semantics = [#tpu.dimension_semantics<parallel>, #tpu.dimension_semantics<arbitrary>, #tpu.dimension_semantics<arbitrary>], iteration_bounds = array<i64: 1, 2, 1>, scalar_prefetch = 0 : i64, scratch_operands = 0 : i64, tpu.core_type = #tpu.core_type<tc>, window_params = [{transform_indices = @transform_0, window_bounds = array<i64: 1, 4, 256>}, {pipeline_mode = #tpu.pipeline_mode<synchronous>, transform_indices = @transform_1, window_bounds = array<i64: 32, 4>}, {pipeline_mode = #tpu.pipeline_mode<synchronous>, transform_indices = @transform_2, window_bounds = array<i64: 32, 1>}, {transform_indices = @transform_3, window_bounds = array<i64: 1, 16, 1>}, {transform_indices = @transform_4, window_bounds = array<i64: 1, 16, 1>}, {transform_indices = @transform_5, window_bounds = array<i64: 1, 16, 16>}]} {
    %c0_i32 = arith.constant 0 : i32
    %0 = arith.cmpi eq, %arg1, %c0_i32 : i32
    %c0_i32_0 = arith.constant 0 : i32
    %1 = arith.cmpi eq, %arg2, %c0_i32_0 : i32
    %2 = arith.andi %0, %1 : i1
    %c1_i32 = arith.constant 1 : i32
    %3 = arith.cmpi eq, %arg1, %c1_i32 : i32
    %c0_i32_1 = arith.constant 0 : i32
    %4 = arith.cmpi eq, %arg2, %c0_i32_1 : i32
    %5 = arith.andi %3, %4 : i1
    %6 = arith.extui %2 : i1 to i32
    %c0_i32_2 = arith.constant 0 : i32
    %7 = arith.cmpi ne, %6, %c0_i32_2 : i32
    scf.if %7 {
      %cst_31 = arith.constant 0xFF800000 : f32
      %53 = vector.broadcast %cst_31 : f32 to vector<16x1xf32>
      %c0_32 = arith.constant 0 : index
      %c0_33 = arith.constant 0 : index
      %c0_34 = arith.constant 0 : index
      %54 = vector.load %arg6[%c0_32, %c0_33, %c0_34] : memref<1x16x1xf32, #tpu.memory_space<vmem>>, vector<1x16x1xf32>
      %55 = vector.shape_cast %54 : vector<1x16x1xf32> to vector<16x1xf32>
      %56 = vector.shape_cast %53 : vector<16x1xf32> to vector<1x16x1xf32>
      tpu.vector_store %arg6[%c0_32, %c0_33, %c0_34], %56 {strides = array<i32>} : memref<1x16x1xf32, #tpu.memory_space<vmem>>, vector<1x16x1xf32>,
      %cst_35 = arith.constant 0.000000e+00 : f32
      %57 = vector.broadcast %cst_35 : f32 to vector<16x1xf32>
      %c0_36 = arith.constant 0 : index
      %c0_37 = arith.constant 0 : index
      %c0_38 = arith.constant 0 : index
      %58 = vector.load %arg7[%c0_36, %c0_37, %c0_38] : memref<1x16x1xf32, #tpu.memory_space<vmem>>, vector<1x16x1xf32>
      %59 = vector.shape_cast %58 : vector<1x16x1xf32> to vector<16x1xf32>
      %60 = vector.shape_cast %57 : vector<16x1xf32> to vector<1x16x1xf32>
      tpu.vector_store %arg7[%c0_36, %c0_37, %c0_38], %60 {strides = array<i32>} : memref<1x16x1xf32, #tpu.memory_space<vmem>>, vector<1x16x1xf32>,
      %cst_39 = arith.constant 0.000000e+00 : f32
      %61 = vector.broadcast %cst_39 : f32 to vector<16x16xf32>
      %c0_40 = arith.constant 0 : index
      %c0_41 = arith.constant 0 : index
      %c0_42 = arith.constant 0 : index
      %62 = vector.load %arg8[%c0_40, %c0_41, %c0_42] : memref<1x16x16xf32, #tpu.memory_space<vmem>>, vector<1x16x16xf32>
      %63 = vector.shape_cast %62 : vector<1x16x16xf32> to vector<16x16xf32>
      %64 = vector.shape_cast %61 : vector<16x16xf32> to vector<1x16x16xf32>
      tpu.vector_store %arg8[%c0_40, %c0_41, %c0_42], %64 {strides = array<i32>} : memref<1x16x16xf32, #tpu.memory_space<vmem>>, vector<1x16x16xf32>,
    } else {
    }
    %c0 = arith.constant 0 : index
    %c0_3 = arith.constant 0 : index
    %c0_4 = arith.constant 0 : index
    %8 = vector.load %arg3[%c0, %c0_3, %c0_4] : memref<1x4x256xf32, #tpu.memory_space<vmem>>, vector<1x4x256xf32>
    %9 = vector.shape_cast %8 : vector<1x4x256xf32> to vector<4x256xf32>
    %10 = arith.truncf %9 : vector<4x256xf32> to vector<4x256xbf16>
    %c0_5 = arith.constant 0 : index
    %c0_6 = arith.constant 0 : index
    %11 = vector.load %arg4[%c0_5, %c0_6] : memref<32x4xbf16, #tpu.memory_space<vmem>>, vector<32x4xbf16>
    %cst = arith.constant dense<0.000000e+00> : vector<32x256xf32>
    %12 = tpu.matmul %11, %10, %cst {dimension_numbers = #tpu.dot_dimension_numbers<[1], [0], [0], [1], [0, 0, 1, 1], [], []>} : vector<32x4xbf16>, vector<4x256xbf16>, vector<32x256xf32> -> vector<32x256xf32>
    %c0_7 = arith.constant 0 : index
    %c0_8 = arith.constant 0 : index
    %13 = vector.load %arg5[%c0_7, %c0_8] : memref<32x1xf32, #tpu.memory_space<vmem>>, vector<32x1xf32>
    %14 = vector.broadcast %13 : vector<32x1xf32> to vector<32x256xf32>
    %15 = arith.addf %12, %14 : vector<32x256xf32>
    %16 = vector.extract_strided_slice %15 {offsets = [0, 0], sizes = [16, 256], strides = [1, 1]} : vector<32x256xf32> to vector<16x256xf32>
    %17 = vector.extract_strided_slice %15 {offsets = [16, 0], sizes = [16, 256], strides = [1, 1]} : vector<32x256xf32> to vector<16x256xf32>
    %c0_9 = arith.constant 0 : index
    %c0_10 = arith.constant 0 : index
    %c0_11 = arith.constant 0 : index
    %18 = vector.load %arg6[%c0_9, %c0_10, %c0_11] : memref<1x16x1xf32, #tpu.memory_space<vmem>>, vector<1x16x1xf32>
    %19 = vector.shape_cast %18 : vector<1x16x1xf32> to vector<16x1xf32>
    %cst_12 = arith.constant dense<0xFF800000> : vector<16xf32>
    %20 = vector.multi_reduction <maximumf>, %17, %cst_12 [1] : vector<16x256xf32> to vector<16xf32>
    %21 = vector.shape_cast %20 : vector<16xf32> to vector<16x1xf32>
    %22 = arith.maximumf %19, %21 : vector<16x1xf32>
    %23 = arith.subf %19, %22 : vector<16x1xf32>
    %24 = math.exp %23 : vector<16x1xf32>
    %25 = vector.broadcast %22 : vector<16x1xf32> to vector<16x256xf32>
    %26 = arith.subf %17, %25 : vector<16x256xf32>
    %27 = math.exp %26 : vector<16x256xf32>
    %c0_13 = arith.constant 0 : index
    %c0_14 = arith.constant 0 : index
    %c0_15 = arith.constant 0 : index
    %28 = vector.load %arg7[%c0_13, %c0_14, %c0_15] : memref<1x16x1xf32, #tpu.memory_space<vmem>>, vector<1x16x1xf32>
    %29 = vector.shape_cast %28 : vector<1x16x1xf32> to vector<16x1xf32>
    %30 = arith.mulf %24, %29 : vector<16x1xf32>
    %cst_16 = arith.constant dense<0.000000e+00> : vector<16xf32>
    %31 = vector.multi_reduction <add>, %27, %cst_16 [1] : vector<16x256xf32> to vector<16xf32>
    %32 = vector.shape_cast %31 : vector<16xf32> to vector<16x1xf32>
    %33 = arith.addf %30, %32 : vector<16x1xf32>
    %c0_17 = arith.constant 0 : index
    %c0_18 = arith.constant 0 : index
    %c0_19 = arith.constant 0 : index
    %34 = vector.load %arg7[%c0_17, %c0_18, %c0_19] : memref<1x16x1xf32, #tpu.memory_space<vmem>>, vector<1x16x1xf32>
    %35 = vector.shape_cast %34 : vector<1x16x1xf32> to vector<16x1xf32>
    %36 = vector.shape_cast %33 : vector<16x1xf32> to vector<1x16x1xf32>
    tpu.vector_store %arg7[%c0_17, %c0_18, %c0_19], %36 {strides = array<i32>} : memref<1x16x1xf32, #tpu.memory_space<vmem>>, vector<1x16x1xf32>,
    %c0_20 = arith.constant 0 : index
    %c0_21 = arith.constant 0 : index
    %c0_22 = arith.constant 0 : index
    %37 = vector.load %arg8[%c0_20, %c0_21, %c0_22] : memref<1x16x16xf32, #tpu.memory_space<vmem>>, vector<1x16x16xf32>
    %38 = vector.shape_cast %37 : vector<1x16x16xf32> to vector<16x16xf32>
    %39 = vector.broadcast %24 : vector<16x1xf32> to vector<16x16xf32>
    %40 = arith.mulf %38, %39 : vector<16x16xf32>
    %41 = arith.truncf %27 : vector<16x256xf32> to vector<16x256xbf16>
    %42 = arith.truncf %16 : vector<16x256xf32> to vector<16x256xbf16>
    %cst_23 = arith.constant dense<0.000000e+00> : vector<16x16xf32>
    %43 = tpu.matmul %41, %42, %cst_23 {dimension_numbers = #tpu.dot_dimension_numbers<[1], [1], [0], [0], [0, 0, 1, 0], [], []>} : vector<16x256xbf16>, vector<16x256xbf16>, vector<16x16xf32> -> vector<16x16xf32>
    %44 = arith.addf %40, %43 : vector<16x16xf32>
    %c0_24 = arith.constant 0 : index
    %c0_25 = arith.constant 0 : index
    %c0_26 = arith.constant 0 : index
    %45 = vector.load %arg8[%c0_24, %c0_25, %c0_26] : memref<1x16x16xf32, #tpu.memory_space<vmem>>, vector<1x16x16xf32>
    %46 = vector.shape_cast %45 : vector<1x16x16xf32> to vector<16x16xf32>
    %47 = vector.shape_cast %44 : vector<16x16xf32> to vector<1x16x16xf32>
    tpu.vector_store %arg8[%c0_24, %c0_25, %c0_26], %47 {strides = array<i32>} : memref<1x16x16xf32, #tpu.memory_space<vmem>>, vector<1x16x16xf32>,
    %c0_27 = arith.constant 0 : index
    %c0_28 = arith.constant 0 : index
    %c0_29 = arith.constant 0 : index
    %48 = vector.load %arg6[%c0_27, %c0_28, %c0_29] : memref<1x16x1xf32, #tpu.memory_space<vmem>>, vector<1x16x1xf32>
    %49 = vector.shape_cast %48 : vector<1x16x1xf32> to vector<16x1xf32>
    %50 = vector.shape_cast %22 : vector<16x1xf32> to vector<1x16x1xf32>
    tpu.vector_store %arg6[%c0_27, %c0_28, %c0_29], %50 {strides = array<i32>} : memref<1x16x1xf32, #tpu.memory_space<vmem>>, vector<1x16x1xf32>,
    %51 = arith.extui %5 : i1 to i32
    %c0_i32_30 = arith.constant 0 : i32
    %52 = arith.cmpi ne, %51, %c0_i32_30 : i32
    scf.if %52 {
      %c0_31 = arith.constant 0 : index
      %c0_32 = arith.constant 0 : index
      %c0_33 = arith.constant 0 : index
      %53 = vector.load %arg7[%c0_31, %c0_32, %c0_33] : memref<1x16x1xf32, #tpu.memory_space<vmem>>, vector<1x16x1xf32>
      %54 = vector.shape_cast %53 : vector<1x16x1xf32> to vector<16x1xf32>
      %cst_34 = arith.constant 1.000000e+00 : f32
      %55 = vector.broadcast %cst_34 : f32 to vector<16x1xf32>
      %56 = arith.divf %55, %54 : vector<16x1xf32>
      %c0_35 = arith.constant 0 : index
      %c0_36 = arith.constant 0 : index
      %c0_37 = arith.constant 0 : index
      %57 = vector.load %arg7[%c0_35, %c0_36, %c0_37] : memref<1x16x1xf32, #tpu.memory_space<vmem>>, vector<1x16x1xf32>
      %58 = vector.shape_cast %57 : vector<1x16x1xf32> to vector<16x1xf32>
      %59 = vector.shape_cast %56 : vector<16x1xf32> to vector<1x16x1xf32>
      tpu.vector_store %arg7[%c0_35, %c0_36, %c0_37], %59 {strides = array<i32>} : memref<1x16x1xf32, #tpu.memory_space<vmem>>, vector<1x16x1xf32>,
      %c0_38 = arith.constant 0 : index
      %c0_39 = arith.constant 0 : index
      %c0_40 = arith.constant 0 : index
      %60 = vector.load %arg8[%c0_38, %c0_39, %c0_40] : memref<1x16x16xf32, #tpu.memory_space<vmem>>, vector<1x16x16xf32>
      %61 = vector.shape_cast %60 : vector<1x16x16xf32> to vector<16x16xf32>
      %62 = vector.broadcast %56 : vector<16x1xf32> to vector<16x16xf32>
      %63 = arith.mulf %61, %62 : vector<16x16xf32>
      %c0_41 = arith.constant 0 : index
      %c0_42 = arith.constant 0 : index
      %c0_43 = arith.constant 0 : index
      %64 = vector.load %arg8[%c0_41, %c0_42, %c0_43] : memref<1x16x16xf32, #tpu.memory_space<vmem>>, vector<1x16x16xf32>
      %65 = vector.shape_cast %64 : vector<1x16x16xf32> to vector<16x16xf32>
      %66 = vector.shape_cast %63 : vector<16x16xf32> to vector<1x16x16xf32>
      tpu.vector_store %arg8[%c0_41, %c0_42, %c0_43], %66 {strides = array<i32>} : memref<1x16x16xf32, #tpu.memory_space<vmem>>, vector<1x16x16xf32>,
    } else {
    }
    return
  }
  func.func @transform_0(%arg0: i32, %arg1: i32, %arg2: i32) -> (i32, i32, i32) {
    %c2_i32 = arith.constant 2 : i32
    %0 = arith.muli %arg0, %c2_i32 : i32
    %1 = arith.addi %0, %arg1 : i32
    %c0_i32 = arith.constant 0 : i32
    %c0_i32_0 = arith.constant 0 : i32
    return %1, %c0_i32, %arg2 : i32, i32, i32
  }
  func.func @transform_1(%arg0: i32, %arg1: i32, %arg2: i32) -> (i32, i32) {
    %c0_i32 = arith.constant 0 : i32
    %c0_i32_0 = arith.constant 0 : i32
    %c0_i32_1 = arith.constant 0 : i32
    return %c0_i32, %c0_i32_0 : i32, i32
  }
  func.func @transform_2(%arg0: i32, %arg1: i32, %arg2: i32) -> (i32, i32) {
    %c0_i32 = arith.constant 0 : i32
    %c0_i32_0 = arith.constant 0 : i32
    %c0_i32_1 = arith.constant 0 : i32
    return %c0_i32, %c0_i32_0 : i32, i32
  }
  func.func @transform_3(%arg0: i32, %arg1: i32, %arg2: i32) -> (i32, i32, i32) {
    %c0_i32 = arith.constant 0 : i32
    %c0_i32_0 = arith.constant 0 : i32
    %c0_i32_1 = arith.constant 0 : i32
    return %arg0, %c0_i32, %c0_i32_0 : i32, i32, i32
  }
  func.func @transform_4(%arg0: i32, %arg1: i32, %arg2: i32) -> (i32, i32, i32) {
    %c0_i32 = arith.constant 0 : i32
    %c0_i32_0 = arith.constant 0 : i32
    %c0_i32_1 = arith.constant 0 : i32
    return %arg0, %c0_i32, %c0_i32_0 : i32, i32, i32
  }
  func.func @transform_5(%arg0: i32, %arg1: i32, %arg2: i32) -> (i32, i32, i32) {
    %c0_i32 = arith.constant 0 : i32
    %c0_i32_0 = arith.constant 0 : i32
    %c0_i32_1 = arith.constant 0 : i32
    return %arg0, %c0_i32, %c0_i32_0 : i32, i32, i32
  }
}

</mosaic_0001>

<bundles_post_ra>
// kernel: tpu_custom_call.1
= control target key start
LH: loop header
LB: loop body
LE: loop exit
PB: predicated region body
PF: predicated region fallthrough
CT: control target
= control target key end

     0   :  { %11 = vsyncpa [#allocation3], 0  ;;  %s879_s18 = smov 0   ;;  %s881_s19 = smov 0   ;;  %s999_s0 = inlined_call_operand.vmem [shape: f32[2,4,256], index: 0, kind: input, shape index: {}]   ;;  %s1000_s1 = inlined_call_operand.vmem [shape: bf16[32,4], index: 1, kind: input, shape index: {}]   ;;  %s1001_s2 = inlined_call_operand.vmem [shape: f32[32,1], index: 2, kind: input, shape index: {}]   ;;  %s1002_s3 = inlined_call_operand.vmem [shape: f32[1,16,1], index: 3, kind: output, shape index: {0}]   ;;  %s1003_s4 = inlined_call_operand.vmem [shape: f32[1,16,1], index: 4, kind: output, shape index: {1}]   ;;  %s1004_s5 = inlined_call_operand.hbm [shape: f32[1,16,16], index: 5, kind: output, shape index: {2}]  }
   0x1   :  { %s883_s20 = smov 0  }
   0x2 LB: > { %s698_s21 = sadd.s32 4294967295, %s840_s20   ;;  %s32_s22 = sadd.s32 1, %s836_s19  ;;  %s840_s20 = sphi %s883_s20, %s17_s20   ;;  %s836_s19 = sphi %s881_s19, %s1006_s19   ;;  %s832_s18 = sphi %s879_s18, %s1005_s18  }
   0x3   : > { %p34_p0 = scmp.ge.s32.totalorder %s32_s22, 2  ;;  %p701_p1 = scmp.ge.s32.totalorder %s840_s20, 1 }
   0x4   : > { %p227_p2 = scmp.lt.s32.totalorder %s840_s20, 3 }
   0x5   : > { %s1008_s22 = smov (%p34_p0, %s32_s22), 0 }
   0x6   : > { %p228_p3 = pnand %p701_p1, %p227_p2 }
   0x7   : > { %p269_p4 = scmp.lt.s32.totalorder (!%p228_p3), %s832_s18, 1  ;;  %p291_p5 = scmp.eq.s32.totalorder (!%p228_p3), %s832_s18, 0 }
   0x8   : > { %231 = sbr.rel (%p228_p3) target bundleno = 679 (0x2a7), region = 32  ;;  %p295_p6 = scmp.eq.s32.totalorder (!%p228_p3), %s832_s18, 1 }
   0xd   : > { %s270_s23 = scalar_select %p269_p4, %s832_s18, 1  ;;  %vm300_vm0 = vcmask (%p291_p5), 7168   ;;  %v842_v0 = vmov (%p291_p5), -inf   ;;  %vm305_vm1 = vcmask (%p291_p5), 130048   ;;  %v843_v1 = vmov (%p291_p5), 0.0  }
   0xe   : > { %299 = sbr.rel (!%p291_p5) target bundleno = 20 (0x14), region = 36  ;;  %301 = vst.msk [vmem:[%s1002_s3] sm:$0xff] (%p291_p5), %vm300_vm0, %v842_v0 }
   0xf   : > { %s724_s24 = sshll.u32 %s270_s23, 3  ;;  %302 = vst.msk [vmem:[%s1002_s3 + $0x8] sm:$0xff] (%p291_p5), %vm300_vm0, %v842_v0 }
  0x10   : > { %s276_s27 = scalar_lea.vmem %s999_s0, %s724_s24  ;;  %303 = vst.msk [vmem:[%s1003_s4] sm:$0xff] (%p291_p5), %vm300_vm0, %v843_v1 }
  0x11   : > { %304 = vst.msk [vmem:[%s1003_s4 + $0x8] sm:$0xff] (%p291_p5), %vm300_vm0, %v843_v1 }
  0x12   : > { %306 = vst.msk [vmem:[#allocation2] sm:$0xff] (%p291_p5), %vm305_vm1, %v843_v1 }
  0x13   : > { %307 = vst.msk [vmem:[#allocation2 + $0x8] sm:$0xff] %vm305_vm1, %v843_v1 }
  0x14 PF: > { %v323_v2 = vld [vmem:[%s1001_s2 + $0x10] sm:$0xff]  ;;  %v308_v3 = vld [vmem:[%s276_s27] sm:$0xff]  ;;  %v844_v4 = vmov 0   ;;  %vm362_vm2 = vcmask 1041408   ;;  %v324_v5 = vld [vmem:[%s1001_s2 + $0x18] sm:$0xff]  ;;  %vm355_vm3 = vcmask 31744  }
  0x15   : > { %766 = vset.pattern.permute.xlu0 %v844_v4  ;;  %310 = vst [vmem:[#allocation1] ss:$2 sm:$0xff] %v308_v3  ;;  %768 = vset.pattern.permute.xlu1 %v844_v4  ;;  %v727_v12 = vld [vmem:[%s1000_s1] sm:$0xff]  ;;  %v728_v14 = vld [vmem:[%s1000_s1 + $0x8] sm:$0xff]  ;;  %vm457_vm4 = vcmask 7168   ;;  %vm508_vm5 = vcmask 130048  }
  0x16   : > { %337 = vperm.xlu0 %766, %v323_v2   ;;  %767 = vset.pattern.permute.xlu2 %v844_v4  ;;  %v321_v13 = vld [vmem:[%s1001_s2] sm:$0xff]  ;;  %v322_v31 = vld [vmem:[%s1001_s2 + $0x8] sm:$0xff] }
  0x17   : > { %v407_v32 = vld [vmem:[%s1002_s3] sm:$0xff]  ;;  %v408_v36 = vld [vmem:[%s1002_s3 + $0x8] sm:$0xff] }
  0x1c   : > { %v311_v6 = vld.sshfl [vmem:[#allocation1] sm:$0xff pattern:$0x75316420]  ;;  %v312_v7 = vld.sshfl [vmem:[#allocation1 + $0x8] sm:$0xff pattern:$0x75316420] }
  0x1d   : > { %v315_v8 = vpack.c.bf16 %v311_v6, %v311_v6  ;;  %v316_v9 = vpack.c.bf16 %v312_v7, %v312_v7  ;;  %v445_v7 = vld [vmem:[%s1003_s4] sm:$0xff] }
  0x1e   : > { %342 = vperm.xlu0 %766, %v324_v5  }
  0x1f   : > { %v364_v10 = vsel %vm362_vm2, %v315_v8, 0  ;;  %v367_v11 = vsel %vm362_vm2, %v316_v9, 0 }
  0x20   : > { %376 = vmatpush.bf16.msra.mxu0 %v364_v10  ;;  %395 = vmatpush.bf16.msra.mxu1 %v367_v11 }
  0x23   : > { %714 = vmatmul.msk.bf16.vlgmr.msra.gmra.mxu0 %vm355_vm3, %v727_v12  ;;  %716 = vmatmul.msk.bf16.vlgmr.msra.gmra.mxu1 %vm355_vm3, %v727_v12  ;;  %v446_v12 = vld [vmem:[%s1003_s4 + $0x8] sm:$0xff] }
  0x26   : > { %327 = vperm.xlu0 %766, %v321_v13  }
  0x33   : > { %715 = vmatmul.msk.bf16.gmra.mxu0 %vm355_vm3, %v728_v14  ;;  %717 = vmatmul.msk.bf16.gmra.mxu1 %vm355_vm3, %v728_v14 }
  0x88   : > { %v338_v19 = vpop.permute.xlu0 %337 }
  0x90   : > { %v343_v25 = vpop.permute.xlu0 %342 }
  0x98   : > { %v328_v44 = vpop.permute.xlu0 %327 }
  0xa0   : > { %v378_v15 = vpop.f32.mrf.mxu0  ;;  %v397_v16 = vpop.f32.mrf.mxu1 }
  0xa1   : > { %v379_v46 = vadd.f32 %v378_v15, %v328_v44  ;;  %v398_v47 = vadd.f32 %v397_v16, %v328_v44  ;;  %v460_v16 = vld [vmem:[#allocation2] sm:$0xff] }
  0xa8   : > { %v380_v17 = vpop.f32.mrf.mxu0  ;;  %v399_v18 = vpop.f32.mrf.mxu1 }
  0xb0   : > { %v383_v20 = vpop.f32.mrf.mxu0  ;;  %v402_v21 = vpop.f32.mrf.mxu1 }
  0xb1   : > { %v384_v22 = vadd.f32 %v383_v20, %v338_v19  ;;  %v403_v23 = vadd.f32 %v402_v21, %v338_v19 }
  0xb3   : > { %v409_v24 = vmax.f32 %v384_v22, %v403_v23 }
  0xb5   : > { %410 = vmax.xlane.f32.xlu1 %v409_v24 }
  0xb8   : > { %v385_v26 = vpop.f32.mrf.mxu0  ;;  %v404_v27 = vpop.f32.mrf.mxu1 }
  0xb9   : > { %v386_v28 = vadd.f32 %v385_v26, %v343_v25  ;;  %v405_v29 = vadd.f32 %v404_v27, %v343_v25 }
  0xbb   : > { %v412_v30 = vmax.f32 %v386_v28, %v405_v29 }
  0xbd   : > { %413 = vmax.xlane.f32.xlu1 %v412_v30  ;;  %v845_v30 = vmov (%p295_p6), 0  }
  0xd6   : > { %332 = vperm.xlu1 %768, %v322_v31  }
 0x128   : > { %v411_v33 = vpop.xlane.xlu1 %410 }
 0x129   : > { %v415_v34 = vmax.f32 %v407_v32, %v411_v33 }
 0x12b   : > { %511 = vst.msk [vmem:[%s1002_s3] sm:$0xff] %vm457_vm4, %v415_v34  ;;  %425 = vperm.xlu2 %767, %v415_v34   ;;  %v417_v35 = vsub.f32 %v407_v32, %v415_v34 }
 0x12d   : > { %v419_v37 = vmul.f32 1.442695, %v417_v35 }
 0x12f   : > { %769 = vpow2.f32 %v419_v37 }
 0x130   : > { %v414_v38 = vpop.xlane.xlu1 %413 }
 0x131   : > { %v416_v39 = vmax.f32 %v408_v36, %v414_v38 }
 0x133   : > { %v418_v40 = vsub.f32 %v408_v36, %v416_v39  ;;  %512 = vst.msk [vmem:[%s1002_s3 + $0x8] sm:$0xff] %vm457_vm4, %v416_v39  ;;  %430 = vperm.xlu2 %767, %v416_v39  }
 0x135   : > { %v421_v41 = vmul.f32 1.442695, %v418_v40  ;;  %v770_v42 = vpop.eup %769 }
 0x136   : > { %v447_v8 = vmul.f32 %v770_v42, %v445_v7 }
 0x137   : > { %771 = vpow2.f32 %v421_v41 }
 0x13b   : > { %464 = vperm.xlu2 %767, %v770_v42  }
 0x13d   : > { %v772_v43 = vpop.eup %771 }
 0x13e   : > { %469 = vperm.xlu0 %766, %v772_v43   ;;  %v448_v13 = vmul.f32 %v772_v43, %v446_v12 }
 0x146   : > { %781 = vset.pattern.permute.xlu0 (%p295_p6), %v845_v30 }
 0x148   : > { %v333_v45 = vpop.permute.xlu1 %332 }
 0x149   : > { %v381_v48 = vadd.f32 %v380_v17, %v333_v45  ;;  %v400_v49 = vadd.f32 %v399_v18, %v333_v45 }
 0x14b   : > { %v476_v50 = vpack.c.bf16 %v381_v48, %v379_v46  ;;  %v477_v51 = vpack.c.bf16 %v400_v49, %v398_v47 }
 0x14d   : > { %485 = vmatpush.bf16.xpose.msra.mxu2 %v476_v50  ;;  %499 = vmatpush.bf16.xpose.msra.mxu3 %v477_v51 }
 0x185   : > { %v426_v52 = vpop.permute.xlu2 %425 }
 0x186   : > { %v433_v53 = vsub.f32 %v384_v22, %v426_v52  ;;  %v434_v54 = vsub.f32 %v403_v23, %v426_v52  ;;  %v461_v22 = vld [vmem:[#allocation2 + $0x8] sm:$0xff] }
 0x188   : > { %v437_v55 = vmul.f32 1.442695, %v433_v53  ;;  %v439_v56 = vmul.f32 1.442695, %v434_v54 }
 0x18a   : > { %773 = vpow2.f32 %v437_v55 }
 0x18b   : > { %775 = vpow2.f32 %v439_v56 }
 0x18d   : > { %v431_v57 = vpop.permute.xlu2 %430 }
 0x18e   : > { %v435_v58 = vsub.f32 %v386_v28, %v431_v57  ;;  %v436_v59 = vsub.f32 %v405_v29, %v431_v57 }
 0x190   : > { %v774_v60 = vpop.eup %773  ;;  %v441_v61 = vmul.f32 1.442695, %v435_v58  ;;  %v443_v62 = vmul.f32 1.442695, %v436_v59 }
 0x191   : > { %v776_v63 = vpop.eup %775 }
 0x192   : > { %777 = vpow2.f32 %v441_v61  ;;  %v449_v0 = vadd.f32 %v776_v63, %v774_v60 }
 0x193   : > { %779 = vpow2.f32 %v443_v62 }
 0x194   : > { %450 = vadd.xlane.f32.xlu2 %v449_v0 }
 0x195   : > { %v465_v6 = vpop.permute.xlu2 %464 }
 0x196   : > { %v472_v19 = vmul.f32 %v465_v6, %v460_v16 }
 0x198   : > { %v778_v1 = vpop.eup %777 }
 0x199   : > { %v780_v2 = vpop.eup %779  ;;  %v474_v3 = vpack.c.bf16 %v778_v1, %v774_v60 }
 0x19a   : > { %v452_v4 = vadd.f32 %v780_v2, %v778_v1  ;;  %v475_v5 = vpack.c.bf16 %v780_v2, %v776_v63 }
 0x19b   : > { %486 = vmatmul.bf16.vlgmr.msra.gmra.mxu2 %v474_v3 }
 0x19c   : > { %453 = vadd.xlane.f32.xlu0 %v452_v4  ;;  %500 = vmatmul.bf16.vlgmr.msra.gmra.mxu3 %v475_v5 }
 0x1b0   : > { %v470_v9 = vpop.permute.xlu0 %469 }
 0x1b1   : > { %v473_v25 = vmul.f32 %v470_v9, %v461_v22 }
 0x207   : > { %v451_v10 = vpop.xlane.xlu2 %450 }
 0x208   : > { %v455_v11 = vadd.f32 %v451_v10, %v447_v8 }
 0x20a   : > { %458 = vst.msk [vmem:[%s1003_s4] sm:$0xff] %vm457_vm4, %v455_v11 }
 0x20f   : > { %v454_v14 = vpop.xlane.xlu0 %453 }
 0x210   : > { %v456_v15 = vadd.f32 %v454_v14, %v448_v13 }
 0x211   : > { %v515_v28 = vld [vmem:[%s1003_s4] sm:$0xff] (%p295_p6) }
 0x212   : > { %459 = vst.msk [vmem:[%s1003_s4 + $0x8] sm:$0xff] %vm457_vm4, %v456_v15  ;;  %782 = vrcp.f32 (%p295_p6), %v515_v28  ;;  %vm522_vm6 = vweird.f32 (%p295_p6), %v515_v28  ;;  %v528_v34 = vand.u32 (%p295_p6), 2147483648, %v515_v28  ;;  %v526_v37 = vand.u32 (%p295_p6), 2147483647, %v515_v28 }
 0x214   : > { %v529_v42 = vor.u32 (%p295_p6), 1.1754944e-38, %v528_v34  ;;  %vm527_vm11 = vcmp.eq.f32.partialorder (%p295_p6), %v526_v37, 8.507059e+37 }
 0x218   : > { %v783_v31 = vpop.eup (%p295_p6), %782 }
 0x219   : > { %v516_v29 = vld [vmem:[%s1003_s4 + $0x8] sm:$0xff] (%p295_p6)  ;;  %v518_v33 = vmul.f32 (%p295_p6), %v783_v31, %v515_v28  ;;  %vm523_vm7 = vweird.f32 (%p295_p6), %v783_v31 }
 0x21a   : > { %784 = vrcp.f32 (%p295_p6), %v516_v29  ;;  %v543_v38 = vand.u32 (%p295_p6), 2147483648, %v516_v29  ;;  %vm537_vm8 = vweird.f32 (%p295_p6), %v516_v29  ;;  %v541_v40 = vand.u32 (%p295_p6), 2147483647, %v516_v29  ;;  %vm524_vm10 = vmor (%p295_p6), %vm522_vm6, %vm523_vm7 }
 0x21b   : > { %v519_v36 = vsub.f32 (%p295_p6), 1.0, %v518_v33 }
 0x21c   : > { %v544_v45 = vor.u32 (%p295_p6), 1.1754944e-38, %v543_v38  ;;  %vm542_vm13 = vcmp.eq.f32.partialorder (%p295_p6), %v541_v40, 8.507059e+37 }
 0x21d   : > { %v520_v41 = vmul.f32 (%p295_p6), %v783_v31, %v519_v36 }
 0x21e   : > { %v487_v17 = vpop.f32.mrf.mxu2 }
 0x21f   : > { %v501_v18 = vpop.f32.mrf.mxu3  ;;  %v521_v44 = vadd.f32 (%p295_p6), %v783_v31, %v520_v41 }
 0x220   : > { %v502_v20 = vadd.f32 %v501_v18, %v487_v17  ;;  %v785_v32 = vpop.eup (%p295_p6), %784 }
 0x221   : > { %v533_v35 = vmul.f32 (%p295_p6), %v785_v32, %v516_v29  ;;  %vm538_vm9 = vweird.f32 (%p295_p6), %v785_v32  ;;  %v525_v47 = vsel (%p295_p6), %vm524_vm10, %v783_v31, %v521_v44 }
 0x222   : > { %v506_v21 = vadd.f32 %v502_v20, %v472_v19  ;;  %vm539_vm12 = vmor (%p295_p6), %vm537_vm8, %vm538_vm9  ;;  %v530_v48 = vsel (%p295_p6), %vm527_vm11, %v529_v42, %v525_v47 }
 0x223   : > { %v534_v39 = vsub.f32 (%p295_p6), 1.0, %v533_v35  ;;  %553 = vperm.xlu0 (%p295_p6), %781, %v530_v48   ;;  %547 = vst.msk [vmem:[%s1003_s4] sm:$0xff] (%p295_p6), %vm457_vm4, %v530_v48 }
 0x224   : > { %509 = vst.msk [vmem:[#allocation2] sm:$0xff] %vm508_vm5, %v506_v21 }
 0x225   : > { %v535_v43 = vmul.f32 (%p295_p6), %v785_v32, %v534_v39 }
 0x226   : > { %v489_v23 = vpop.f32.mrf.mxu2 }
 0x227   : > { %v503_v24 = vpop.f32.mrf.mxu3  ;;  %v536_v46 = vadd.f32 (%p295_p6), %v785_v32, %v535_v43 }
 0x228   : > { %v504_v26 = vadd.f32 %v503_v24, %v489_v23  ;;  %514 = sbr.rel (!%p295_p6) target bundleno = 673 (0x2a1), region = 40 }
 0x229   : > { %v540_v49 = vsel (%p295_p6), %vm539_vm12, %v785_v32, %v536_v46 }
 0x22a   : > { %v507_v27 = vadd.f32 %v504_v26, %v473_v25  ;;  %v545_v50 = vsel (%p295_p6), %vm542_vm13, %v544_v45, %v540_v49 }
 0x22b   : > { %548 = vst.msk [vmem:[%s1003_s4 + $0x8] sm:$0xff] (%p295_p6), %vm457_vm4, %v545_v50  ;;  %558 = vperm.xlu0 (%p295_p6), %781, %v545_v50   ;;  %v549_v51 = vld [vmem:[#allocation2] sm:$0xff] (%p295_p6) }
 0x22c   : > { %510 = vst.msk [vmem:[#allocation2 + $0x8] sm:$0xff] %vm508_vm5, %v507_v27 }
 0x233   : > { %v550_v54 = vld [vmem:[#allocation2 + $0x8] sm:$0xff] }
 0x295   : > { %v554_v52 = vpop.permute.xlu0 %553 }
 0x296   : > { %v561_v53 = vmul.f32 %v554_v52, %v549_v51 }
 0x298   : > { %563 = vst.msk [vmem:[#allocation2] sm:$0xff] %vm508_vm5, %v561_v53 }
 0x29d   : > { %v559_v55 = vpop.permute.xlu0 %558 }
 0x29e   : > { %v562_v56 = vmul.f32 %v559_v55, %v550_v54 }
 0x2a0   : > { %564 = vst.msk [vmem:[#allocation2 + $0x8] sm:$0xff] %vm508_vm5, %v562_v56 }
 0x2a1 PF: > { %p733_p7 = scmp.eq.s32.totalorder %s698_s21, 1  ;;  %s591_s8 = sshll.u32 %s1004_s5, 4  ;;  %s592_s8 = int_to_ptr.hbm [resolvable:$true] %s591_s8 }
 0x2a2   : > { %s846_s9 = smov [#allocation2]   ;;  %s847_s11 = smov 128  }
 0x2a3   : > { %s589_s10 = sshll.u32 %s846_s9, 4  ;;  %s848_s12 = smov 8   ;;  %s590_s10 = int_to_ptr.vmem [resolvable:$true] %s589_s10 }
 0x2a4   : > { %730 = dma.vmem_to_hbm [thread:$0]  (%p733_p7), %s590_s10, 256, %s592_s8, [#allocation3], %s847_s11, %s847_s11, %s848_s12  }
 0x2a5   : > { %827 = dma.done.wait (%p733_p7), [#allocation3], 256  }
 0x2a6   : > { %829 = vsyncadd (%p733_p7), [#allocation3], 4294967040 }
 0x2a7 PF: > { %s17_s20 = sadd.s32 1, %s840_s20   ;;  %s1005_s18 = smov %s836_s19 }
 0x2a8   : > { %p14_p8 = scmp.ge.s32.totalorder %s17_s20, 4   ;;  %s1006_s19 = smov %s1008_s22 }
 0x2aa   :  { %16 = sbr.rel (!%p14_p8) target bundleno = 2 (0x2), region = 92 }
 0x2af   :  { %624 = vsyncpa [#allocation3], 1 }
 0x2b0   :  { %626 = vsyncpa [#allocation3 + $0x1], 1 }

</bundles_post_ra>
